<compile_context>
chip_gen: v5e
topology: v5e:2x2
jax: 0.10.0
libtpu: 0.0.40
codegen_flags: <defaults>
</compile_context>

<pallas_src>
import math

import jax
import jax.numpy as jnp
from jax import lax
from jax.experimental import pallas as pl
from jax.experimental.pallas import tpu as pltpu

# ----------------------------- problem sizes -----------------------------
B = 8                      # number of timesteps (batch)
FREQ_DIM = 256             # frequency_embedding_size (lane-dense: 2*128)
HIDDEN = 128               # hidden_size              (lane-dense: 1*128)
HALF = FREQ_DIM // 2       # 128
MAX_PERIOD = 10000.0
NEG_LOG_COEF = -math.log(MAX_PERIOD) / HALF   # constant folded at trace time


# ------------------------------- the kernel -------------------------------
def timestep_embedder_kernel(t_ref, w1_ref, b1_ref, w2_ref, b2_ref, out_ref):
    t = t_ref[...]                                             # (B, 1) f32

    # Sinusoidal frequencies, computed in-kernel from a lane iota (f32 path).
    idx = lax.broadcasted_iota(jnp.int32, (1, HALF), 1).astype(jnp.float32)
    freqs = jnp.exp(NEG_LOG_COEF * idx)                        # (1, HALF)
    args = t * freqs                                           # (B, HALF)
    # Lane-boundary concat at 128 lanes: vreg-granular, no XLU relayout.
    emb = jnp.concatenate([jnp.cos(args), jnp.sin(args)], axis=-1)   # (B, FREQ_DIM)
    # NOTE: FREQ_DIM is even, so the PyTorch odd-dim zero-pad branch is
    # statically dead and not emitted.

    # fc1: single K=256 MXU push, bf16 operands, f32 accumulation, f32 bias.
    h = (jnp.dot(emb.astype(jnp.bfloat16), w1_ref[...],
                 preferred_element_type=jnp.float32)
         + b1_ref[...])                                        # (B, HIDDEN) f32

    # SiLU, denominator via EUP approx reciprocal (exp + rcp in the EUP slot).
    h = h * pl.reciprocal(1.0 + jnp.exp(-h), approx=True)

    # fc2: bf16 operands, f32 accumulation, f32 bias.
    out = (jnp.dot(h.astype(jnp.bfloat16), w2_ref[...],
                   preferred_element_type=jnp.float32)
           + b2_ref[...])                                      # (B, HIDDEN)
    out_ref[...] = out.astype(out_ref.dtype)


# ------------------------------ the wrapper ------------------------------
def timestep_embedder_forward(t, params):
    bsz = t.shape[0]
    t2d = t.reshape(bsz, 1).astype(jnp.float32)                # (B, 1)

    # bf16 weights: halves per-call weight DMA; biases stay f32.
    w1 = params["w1"].astype(jnp.bfloat16)
    w2 = params["w2"].astype(jnp.bfloat16)

    vmem = pl.BlockSpec(memory_space=pltpu.MemorySpace.VMEM)   # whole-array, resident
    return pl.pallas_call(
        timestep_embedder_kernel,
        out_shape=jax.ShapeDtypeStruct((bsz, HIDDEN), jnp.float32),
        in_specs=[vmem, vmem, vmem, vmem, vmem],
        out_specs=vmem,
    )(t2d, w1, params["b1"], w2, params["b2"])


# --------------------------- pure-JAX reference ---------------------------
def timestep_embedder_reference(t, params):
    freqs = jnp.exp(-math.log(MAX_PERIOD)
                    * jnp.arange(HALF, dtype=jnp.float32) / HALF)
    args = t.astype(jnp.float32)[:, None] * freqs[None]
    emb = jnp.concatenate([jnp.cos(args), jnp.sin(args)], axis=-1)   # (B, FREQ_DIM)
    h = emb @ params["w1"] + params["b1"][0]
    h = h * jax.nn.sigmoid(h)
    return h @ params["w2"] + params["b2"][0]


# ------------------------------ parameter init ------------------------------
def init_params(key):
    k1, k2 = jax.random.split(key, 2)
    s = 0.02
    # Weights pre-transposed to (in_features, out_features) so the kernel
    # computes x @ W + b (PyTorch Linear is x @ W.T + b with W (out, in)).
    return {
        "w1": s * jax.random.normal(k1, (FREQ_DIM, HIDDEN), jnp.float32),
        "b1": 0.01 * jnp.arange(HIDDEN, dtype=jnp.float32).reshape(1, HIDDEN),
        "w2": s * jax.random.normal(k2, (HIDDEN, HIDDEN), jnp.float32),
        "b2": 0.005 * jnp.ones((1, HIDDEN), jnp.float32),
    }


if __name__ == "__main__":
    key = jax.random.PRNGKey(0)
    kt, kp = jax.random.split(key, 2)
    # Fractional timesteps in [0, 1000), one per batch element.
    t = jax.random.uniform(kt, (B,), jnp.float32, minval=0.0, maxval=1000.0)
    params = init_params(kp)

    out = jax.block_until_ready(timestep_embedder_forward(t, params))
    ref = jax.block_until_ready(timestep_embedder_reference(t, params))

    assert out.shape == (B, HIDDEN)
    # Tolerance loosened for bf16 weights + approx-reciprocal sigmoid.
    assert jnp.allclose(out, ref, atol=2e-2, rtol=2e-2), (
        f"max abs err {jnp.max(jnp.abs(out - ref))}")

    print("KERNEL_OK")
</pallas_src>

<mosaic_0001>
module attributes {stable_mosaic.version = 11 : i64} {
  func.func @timestep_embedder_kernel(%arg0: memref<8x1xf32, #tpu.memory_space<vmem>>, %arg1: memref<256x128xbf16, #tpu.memory_space<vmem>>, %arg2: memref<1x128xf32, #tpu.memory_space<vmem>>, %arg3: memref<128x128xbf16, #tpu.memory_space<vmem>>, %arg4: memref<1x128xf32, #tpu.memory_space<vmem>>, %arg5: memref<8x128xf32, #tpu.memory_space<vmem>>) attributes {dimension_semantics = [], scalar_prefetch = 0 : i64, scratch_operands = 0 : i64, tpu.core_type = #tpu.core_type<tc>} {
    %c0 = arith.constant 0 : index
    %c0_0 = arith.constant 0 : index
    %0 = vector.load %arg0[%c0, %c0_0] : memref<8x1xf32, #tpu.memory_space<vmem>>, vector<8x1xf32>
    %1 = tpu.iota {dimensions = array<i32: 1>} : vector<1x128xi32>
    %2 = arith.sitofp %1 : vector<1x128xi32> to vector<1x128xf32>
    %cst = arith.constant -0.0719557852 : f32
    %3 = vector.broadcast %cst : f32 to vector<1x128xf32>
    %4 = arith.mulf %3, %2 : vector<1x128xf32>
    %5 = math.exp %4 : vector<1x128xf32>
    %6 = vector.broadcast %0 : vector<8x1xf32> to vector<8x128xf32>
    %7 = vector.broadcast %5 : vector<1x128xf32> to vector<8x128xf32>
    %8 = arith.mulf %6, %7 : vector<8x128xf32>
    %9 = math.cos %8 : vector<8x128xf32>
    %10 = math.sin %8 : vector<8x128xf32>
    %11 = tpu.concatenate %9, %10 in 1 : vector<8x128xf32>, vector<8x128xf32> -> vector<8x256xf32>
    %12 = arith.truncf %11 : vector<8x256xf32> to vector<8x256xbf16>
    %c0_1 = arith.constant 0 : index
    %c0_2 = arith.constant 0 : index
    %13 = vector.load %arg1[%c0_1, %c0_2] : memref<256x128xbf16, #tpu.memory_space<vmem>>, vector<256x128xbf16>
    %cst_3 = arith.constant dense<0.000000e+00> : vector<8x128xf32>
    %14 = tpu.matmul %12, %13, %cst_3 {dimension_numbers = #tpu.dot_dimension_numbers<[1], [0], [0], [1], [0, 0, 1, 1], [], []>} : vector<8x256xbf16>, vector<256x128xbf16>, vector<8x128xf32> -> vector<8x128xf32>
    %c0_4 = arith.constant 0 : index
    %c0_5 = arith.constant 0 : index
    %15 = vector.load %arg2[%c0_4, %c0_5] : memref<1x128xf32, #tpu.memory_space<vmem>>, vector<1x128xf32>
    %16 = vector.broadcast %15 : vector<1x128xf32> to vector<8x128xf32>
    %17 = arith.addf %14, %16 : vector<8x128xf32>
    %cst_6 = arith.constant 0.000000e+00 : f32
    %18 = vector.broadcast %cst_6 : f32 to vector<8x128xf32>
    %19 = arith.subf %18, %17 : vector<8x128xf32>
    %20 = math.exp %19 : vector<8x128xf32>
    %cst_7 = arith.constant 1.000000e+00 : f32
    %21 = vector.broadcast %cst_7 : f32 to vector<8x128xf32>
    %22 = arith.addf %21, %20 : vector<8x128xf32>
    %23 = tpu.reciprocal %22 {approx = true} : vector<8x128xf32> -> vector<8x128xf32>
    %24 = arith.mulf %17, %23 : vector<8x128xf32>
    %25 = arith.truncf %24 : vector<8x128xf32> to vector<8x128xbf16>
    %c0_8 = arith.constant 0 : index
    %c0_9 = arith.constant 0 : index
    %26 = vector.load %arg3[%c0_8, %c0_9] : memref<128x128xbf16, #tpu.memory_space<vmem>>, vector<128x128xbf16>
    %cst_10 = arith.constant dense<0.000000e+00> : vector<8x128xf32>
    %27 = tpu.matmul %25, %26, %cst_10 {dimension_numbers = #tpu.dot_dimension_numbers<[1], [0], [0], [1], [0, 0, 1, 1], [], []>} : vector<8x128xbf16>, vector<128x128xbf16>, vector<8x128xf32> -> vector<8x128xf32>
    %c0_11 = arith.constant 0 : index
    %c0_12 = arith.constant 0 : index
    %28 = vector.load %arg4[%c0_11, %c0_12] : memref<1x128xf32, #tpu.memory_space<vmem>>, vector<1x128xf32>
    %29 = vector.broadcast %28 : vector<1x128xf32> to vector<8x128xf32>
    %30 = arith.addf %27, %29 : vector<8x128xf32>
    %c0_13 = arith.constant 0 : index
    %c0_14 = arith.constant 0 : index
    %31 = vector.load %arg5[%c0_13, %c0_14] : memref<8x128xf32, #tpu.memory_space<vmem>>, vector<8x128xf32>
    tpu.vector_store %arg5[%c0_13, %c0_14], %30 {strides = array<i32>} : memref<8x128xf32, #tpu.memory_space<vmem>>, vector<8x128xf32>,
    return
  }
}

</mosaic_0001>

<bundles_post_ra>
// kernel: tpu_custom_call.1
= control target key start
LH: loop header
LB: loop body
LE: loop exit
PB: predicated region body
PF: predicated region fallthrough
CT: control target
= control target key end

     0   :  { %10 = vsyncpa [#allocation3], 0  ;;  %s988_s0 = inlined_call_operand.vmem [shape: f32[8,1], index: 0, kind: input, shape index: {}]   ;;  %s989_s1 = inlined_call_operand.hbm [shape: bf16[256,128], index: 1, kind: input, shape index: {}]   ;;  %s990_s2 = inlined_call_operand.vmem [shape: f32[1,128], index: 2, kind: input, shape index: {}]   ;;  %s991_s3 = inlined_call_operand.hbm [shape: bf16[128,128], index: 3, kind: input, shape index: {}]   ;;  %s992_s4 = inlined_call_operand.vmem [shape: f32[1,128], index: 4, kind: input, shape index: {}]   ;;  %s993_s5 = inlined_call_operand.hbm [shape: f32[8,128], index: 5, kind: output, shape index: {}]  }
   0x1   :  { %11 = vsyncpa [#allocation6], 0 }
   0x2   :  { %12 = vsyncpa [#allocation4], 0  ;;  %s19_s20 = sshll.u32 %s989_s1, 4  ;;  %s867_s21 = smov [#allocation2]   ;;  %s20_s20 = int_to_ptr.hbm [resolvable:$true] %s19_s20 }
   0x3   :  { %s21_s22 = sshll.u32 %s867_s21, 4  ;;  %s34_s25 = sshll.u32 %s991_s3, 4  ;;  %s22_s22 = int_to_ptr.vmem [resolvable:$true] %s21_s22  ;;  %s35_s25 = int_to_ptr.hbm [resolvable:$true] %s34_s25 }
   0x4   :  { %s868_s26 = smov 64   ;;  %s869_s27 = smov 4  }
   0x5   :  { %27 = dma.hbm_to_vmem [thread:$0]  %s20_s20, 2048, %s22_s22, [#allocation3], %s868_s26, %s868_s26, %s869_s27  }
   0x6   :  { %s870_s28 = smov [#allocation5]  }
   0x7   :  { %s36_s29 = sshll.u32 %s870_s28, 4  ;;  %s37_s29 = int_to_ptr.vmem [resolvable:$true] %s36_s29 }
   0x8   :  { %42 = dma.hbm_to_vmem [thread:$0]  %s35_s25, 1024, %s37_s29, [#allocation6], %s868_s26, %s868_s26, %s869_s27  }
   0x9   :  { %861 = dma.done.wait [#allocation3], 2048  }
   0xa   :  { %862 = vsyncadd [#allocation3], 4294965248 }
   0xb   :  { %863 = dma.done.wait [#allocation6], 1024  }
   0xc   :  { %864 = vsyncadd [#allocation6], 4294966272  ;;  %v871_v0 = vmov 0   ;;  %v53_v1 = vld [vmem:[%s988_s0] sm:$0xff]  ;;  %v54_v2 = vlaneseq  ;;  %v751_v7 = vld [vmem:[#allocation2 + $0x38] sm:$0xff]  ;;  %s631_s11 = sshll.u32 %s993_s5, 4  ;;  %s632_s11 = int_to_ptr.hbm [resolvable:$true] %s631_s11 }
   0xd   :  { %780 = vset.pattern.permute.xlu0 %v871_v0  ;;  %v759_v8 = vld [vmem:[#allocation2 + $0x78] sm:$0xff]  ;;  %509 = vmatpush.bf16.msra.mxu0 %v751_v7  ;;  %v750_v9 = vld [vmem:[#allocation2 + $0x30] sm:$0xff]  ;;  %v749_v11 = vld [vmem:[#allocation2 + $0x28] sm:$0xff]  ;;  %v872_v35 = vmov 683565275  }
   0xe   :  { %62 = vperm.xlu0 %780, %v53_v1   ;;  %v55_v3 = vand.u32 127, %v54_v2  ;;  %522 = vmatpush.bf16.msra.mxu1 %v759_v8  ;;  %v758_v10 = vld [vmem:[#allocation2 + $0x70] sm:$0xff]  ;;  %v757_v12 = vld [vmem:[#allocation2 + $0x68] sm:$0xff]  ;;  %v748_v16 = vld [vmem:[#allocation2 + $0x20] sm:$0xff]  ;;  %v873_v37 = vmov 2475754826  }
   0xf   :  { %v756_v17 = vld [vmem:[#allocation2 + $0x60] sm:$0xff]  ;;  %v747_v20 = vld [vmem:[#allocation2 + $0x18] sm:$0xff]  ;;  %v746_v25 = vld [vmem:[#allocation2 + $0x10] sm:$0xff]  ;;  %v874_v39 = vmov 2131351028  }
  0x10   :  { %v56_v4 = vcvt.s32.f32 %v55_v3  ;;  %v755_v21 = vld [vmem:[#allocation2 + $0x58] sm:$0xff]  ;;  %v754_v26 = vld [vmem:[#allocation2 + $0x50] sm:$0xff]  ;;  %v745_v30 = vld [vmem:[#allocation2 + $0x8] sm:$0xff]  ;;  %v875_v41 = vmov 2102212464  }
  0x11   :  { %510 = vmatpush.bf16.msra.mxu0 %v750_v9  ;;  %v753_v32 = vld [vmem:[#allocation2 + $0x48] sm:$0xff]  ;;  %v876_v46 = vmov 920167782   ;;  %v744_v48 = vld [vmem:[#allocation2] sm:$0xff]  ;;  %v877_v50 = vmov 1326507024  }
  0x12   :  { %v57_v5 = vmul.f32 -0.071955785, %v56_v4  ;;  %523 = vmatpush.bf16.msra.mxu1 %v758_v10  ;;  %v752_v53 = vld [vmem:[#allocation2 + $0x40] sm:$0xff] }
  0x14   :  { %v58_v6 = vmul.f32 1.442695, %v57_v5 }
  0x15   :  { %511 = vmatpush.bf16.msra.mxu0 %v749_v11 }
  0x16   :  { %783 = vpow2.f32 %v58_v6  ;;  %524 = vmatpush.bf16.msra.mxu1 %v757_v12 }
  0x19   :  { %512 = vmatpush.bf16.msra.mxu0 %v748_v16 }
  0x1a   :  { %525 = vmatpush.bf16.msra.mxu1 %v756_v17 }
  0x1c   :  { %v784_v13 = vpop.eup %783 }
  0x1d   :  { %513 = vmatpush.bf16.msra.mxu0 %v747_v20 }
  0x1e   :  { %526 = vmatpush.bf16.msra.mxu1 %v755_v21 }
  0x21   :  { %514 = vmatpush.bf16.msra.mxu0 %v746_v25 }
  0x22   :  { %527 = vmatpush.bf16.msra.mxu1 %v754_v26 }
  0x25   :  { %515 = vmatpush.bf16.msra.mxu0 %v745_v30 }
  0x26   :  { %528 = vmatpush.bf16.msra.mxu1 %v753_v32 }
  0x29   :  { %516 = vmatpush.bf16.msra.mxu0 %v744_v48 }
  0x2a   :  { %529 = vmatpush.bf16.msra.mxu1 %v752_v53 }
  0x80   :  { %v63_v14 = vpop.permute.xlu0 %62 }
  0x81   :  { %v919_v15 = vmul.f32 %v784_v13, %v63_v14 }
  0x83   :  { %v69_v18 = vand.u32 2139095040, %v919_v15  ;;  %v66_v22 = vand.u32 2147483647, %v919_v15  ;;  %vm68_vm12 = vcmp.lt.s32.totalorder %v919_v15, 0 }
  0x85   :  { %v70_v19 = vshrl.u32 %v69_v18, 23  ;;  %v73_v27 = vand.u32 8388607, %v66_v22  ;;  %vm67_vm13 = vcmp.le.f32.partialorder %v66_v22, 0.7853982 }
  0x87   :  { %v642_v23 = vadd.s32 4294967169, %v70_v19  ;;  %v74_v31 = vor.u32 8388608, %v73_v27 }
  0x89   :  { %v76_v24 = vadd.s32 1, %v642_v23  ;;  %v935_v52 = vshll.u32 %v74_v31, 8 }
  0x8b   :  { %vm77_vm0 = vcmp.gt.s32.totalorder %v76_v24, 0  ;;  %v115_v2 = vand.u32 65535, %v935_v52  ;;  %v116_v4 = vshrl.u32 %v935_v52, 16 }
  0x8c   :  { %v78_v28 = vsel %vm77_vm0, %v76_v24, 0 }
  0x8d   :  { %v80_v29 = vand.u32 31, %v78_v28  ;;  %v925_v33 = vshrl.u32 %v78_v28, 5 }
  0x8f   :  { %v927_v34 = vsub.s32 32, %v80_v29  ;;  %v83_v36 = vshll.u32 %v872_v35, %v80_v29  ;;  %v86_v38 = vshll.u32 %v873_v37, %v80_v29  ;;  %v89_v40 = vshll.u32 %v874_v39, %v80_v29 }
  0x90   :  { %v92_v42 = vshll.u32 %v875_v41, %v80_v29  ;;  %v95_v49 = vshll.u32 %v876_v46, %v80_v29  ;;  %vm98_vm1 = vcmp.lt.s32.totalorder %v925_v33, 1  ;;  %vm101_vm2 = vcmp.lt.s32.totalorder %v925_v33, 4 }
  0x91   :  { %v84_v43 = vshrl.u32 %v873_v37, %v927_v34  ;;  %v87_v44 = vshrl.u32 %v874_v39, %v927_v34  ;;  %v90_v45 = vshrl.u32 %v875_v41, %v927_v34  ;;  %v93_v47 = vshrl.u32 %v876_v46, %v927_v34 }
  0x92   :  { %v96_v51 = vshrl.u32 %v877_v50, %v927_v34  ;;  %vm100_vm3 = vcmp.lt.s32.totalorder %v925_v33, 3  ;;  %vm99_vm4 = vcmp.lt.s32.totalorder %v925_v33, 2  ;;  %v82_v30 = vshrl.u32 %v872_v35, %v927_v34 }
  0x93   :  { %v85_v54 = vor.u32 %v84_v43, %v83_v36  ;;  %v88_v55 = vor.u32 %v87_v44, %v86_v38  ;;  %v91_v56 = vor.u32 %v90_v45, %v89_v40  ;;  %v94_v57 = vor.u32 %v93_v47, %v92_v42 }
  0x94   :  { %v97_v58 = vor.u32 %v96_v51, %v95_v49 }
  0x95   :  { %v106_v59 = vsel %vm98_vm1, %v85_v54, %v88_v55  ;;  %v107_v60 = vsel %vm101_vm2, %v94_v57, 920167782  ;;  %v110_v61 = vsel %vm98_vm1, %v88_v55, %v91_v56  ;;  %v103_v27 = vsel %vm101_vm2, %v91_v56, 2102212464 }
  0x96   :  { %v108_v62 = vsel %vm100_vm3, %v91_v56, %v107_v60  ;;  %v111_v63 = vsel %vm101_vm2, %v97_v58, 1326507024  ;;  %v102_v39 = vsel %vm98_vm1, %v82_v30, %v85_v54  ;;  %v104_v40 = vsel %vm100_vm3, %v88_v55, %v103_v27 }
  0x97   :  { %v112_v1 = vsel %vm100_vm3, %v94_v57, %v111_v63  ;;  %v109_v3 = vsel %vm99_vm4, %v106_v59, %v108_v62  ;;  %v105_v35 = vsel %vm99_vm4, %v102_v39, %v104_v40 }
  0x98   :  { %v113_v5 = vsel %vm99_vm4, %v110_v61, %v112_v1  ;;  %v139_v6 = vand.u32 65535, %v109_v3  ;;  %v140_v7 = vshrl.u32 %v109_v3, 16  ;;  %v159_v49 = vmul.u32 %v935_v52, %v105_v35 }
  0x99   :  { %v117_v8 = vand.u32 65535, %v113_v5  ;;  %v118_v9 = vshrl.u32 %v113_v5, 16  ;;  %vm209_vm4 = vweird.f32 %v919_v15 }
  0x9a   :  { %v142_v10 = vmul.u32 %v140_v7, %v115_v2  ;;  %v143_v11 = vmul.u32 %v139_v6, %v116_v4  ;;  %v141_v14 = vmul.u32 %v139_v6, %v115_v2  ;;  %v144_v19 = vmul.u32 %v140_v7, %v116_v4  ;;  %v767_v6 = vld [vmem:[#allocation5 + $0x38] sm:$0xff] }
  0x9b   :  { %v120_v12 = vmul.u32 %v118_v9, %v115_v2  ;;  %v121_v13 = vmul.u32 %v117_v8, %v116_v4  ;;  %v119_v17 = vmul.u32 %v117_v8, %v115_v2  ;;  %v122_v20 = vmul.u32 %v118_v9, %v116_v4  ;;  %610 = vmatpush.bf16.msra.mxu2 %v767_v6 }
  0x9c   :  { %v145_v16 = vshll.u32 %v142_v10, 16  ;;  %v147_v21 = vshll.u32 %v143_v11, 16  ;;  %v146_v37 = vshrl.u32 %v142_v10, 16  ;;  %v148_v43 = vshrl.u32 %v143_v11, 16 }
  0x9d   :  { %v123_v18 = vshll.u32 %v120_v12, 16  ;;  %v125_v24 = vshll.u32 %v121_v13, 16  ;;  %v124_v41 = vshrl.u32 %v120_v12, 16  ;;  %v126_v45 = vshrl.u32 %v121_v13, 16 }
  0x9e   :  { %vm149_vm5 = vc.u32 %v141_v14, %v145_v16  ;;  %v151_v23 = vadd.s32 %v145_v16, %v141_v14 }
  0x9f   :  { %vm127_vm6 = vc.u32 %v119_v17, %v123_v18  ;;  %v129_v25 = vadd.s32 %v123_v18, %v119_v17  ;;  %v150_v26 = vsel %vm149_vm5, 1, %v871_v0 }
  0xa0   :  { %v128_v28 = vsel %vm127_vm6, 1, %v871_v0  ;;  %v152_v29 = vadd.s32 %v150_v26, %v144_v19  ;;  %vm153_vm7 = vc.u32 %v151_v23, %v147_v21 }
  0xa1   :  { %v130_v31 = vadd.s32 %v128_v28, %v122_v20  ;;  %vm131_vm8 = vc.u32 %v129_v25, %v125_v24  ;;  %v154_v32 = vsel %vm153_vm7, 1, %v871_v0 }
  0xa2   :  { %v132_v36 = vsel %vm131_vm8, 1, %v871_v0  ;;  %v156_v38 = vadd.s32 %v154_v32, %v152_v29  ;;  %v155_v0 = vadd.s32 %v151_v23, %v147_v21 }
  0xa3   :  { %v134_v42 = vadd.s32 %v132_v36, %v130_v31 }
  0xa4   :  { %v157_v44 = vadd.s32 %v156_v38, %v146_v37 }
  0xa5   :  { %v135_v34 = vadd.s32 %v134_v42, %v124_v41 }
  0xa6   :  { %v158_v46 = vadd.s32 %v157_v44, %v148_v43 }
  0xa7   :  { %v136_v47 = vadd.s32 %v135_v34, %v126_v45 }
  0xa8   :  { %v162_v48 = vadd.s32 1, %v158_v46 }
  0xa9   :  { %vm161_vm9 = vc.u32 %v136_v47, %v155_v0  ;;  %v160_v61 = vadd.s32 %v155_v0, %v136_v47  ;;  %v766_v47 = vld [vmem:[#allocation5 + $0x30] sm:$0xff]  ;;  %v765_v0 = vld [vmem:[#allocation5 + $0x28] sm:$0xff] }
  0xaa   :  { %v163_v50 = vsel %vm161_vm9, %v162_v48, %v158_v46  ;;  %611 = vmatpush.bf16.msra.mxu2 %v766_v47  ;;  %v764_v48 = vld [vmem:[#allocation5 + $0x20] sm:$0xff] }
  0xab   :  { %v164_v51 = vadd.s32 %v163_v50, %v159_v49  ;;  %v763_v49 = vld [vmem:[#allocation5 + $0x18] sm:$0xff]  ;;  %v762_v50 = vld [vmem:[#allocation5 + $0x10] sm:$0xff] }
  0xad   :  { %v165_v53 = vadd.s32 536870912, %v164_v51 }
  0xae   :  { %612 = vmatpush.bf16.msra.mxu2 %v765_v0 }
  0xaf   :  { %v166_v54 = vshrl.u32 %v165_v53, 30  ;;  %v781_v53 = vld [vmem:[%s990_s2] ss:$0 sm:$0xff]  ;;  %s878_s2 = smov [#allocation7]  }
  0xb0   :  { %s629_s8 = sshll.u32 %s878_s2, 4  ;;  %s630_s8 = int_to_ptr.vmem [resolvable:$true] %s629_s8 }
  0xb1   :  { %v167_v55 = vshll.u32 %v166_v54, 30  ;;  %v190_v12 = vsub.s32 4, %v166_v54 }
  0xb2   :  { %613 = vmatpush.bf16.msra.mxu2 %v764_v48 }
  0xb3   :  { %v168_v56 = vsub.s32 %v164_v51, %v167_v55  ;;  %v191_v18 = vsel %vm68_vm12, %v190_v12, %v166_v54  ;;  %v761_v51 = vld [vmem:[#allocation5 + $0x8] sm:$0xff] }
  0xb4   :  { %v193_v21 = vsel %vm67_vm13, 0, %v191_v18 }
  0xb5   :  { %vm169_vm10 = vcmp.lt.s32.totalorder %v168_v56, 0  ;;  %v170_v57 = vsub.s32 0, %v168_v56  ;;  %v364_v27 = vadd.s32 3, %v193_v21  ;;  %v210_v31 = vand.u32 3, %v193_v21 }
  0xb6   :  { %614 = vmatpush.bf16.msra.mxu2 %v763_v49 }
  0xb7   :  { %v171_v58 = vsel %vm169_vm10, %v170_v57, %v168_v56  ;;  %v365_v32 = vand.u32 3, %v364_v27  ;;  %vm211_vm14 = vcmp.lt.s32.totalorder %v210_v31, 2  ;;  %vm212_vm15 = vcmp.eq.s32.totalorder %v210_v31, 0 }
  0xb8   :  { %v172_v59 = vclz %v171_v58  ;;  %vm215_vm0 = vcmp.eq.s32.totalorder %v210_v31, 2 }
  0xb9   :  { %vm366_vm1 = vcmp.lt.s32.totalorder %v365_v32, 2  ;;  %vm367_vm2 = vcmp.eq.s32.totalorder %v365_v32, 0  ;;  %vm370_vm3 = vcmp.eq.s32.totalorder %v365_v32, 2 }
  0xba   :  { %v643_v60 = vadd.s32 4294967294, %v172_v59  ;;  %615 = vmatpush.bf16.msra.mxu2 %v762_v50 }
  0xbc   :  { %vm644_vm11 = vcmp.lt.s32.totalorder %v643_v60, 0 }
  0xbd   :  { %v175_v33 = vsel %vm644_vm11, 0, %v643_v60 }
  0xbe   :  { %v176_v62 = vsub.s32 32, %v175_v33  ;;  %v180_v63 = vsub.s32 4294967266, %v175_v33  ;;  %v177_v1 = vshll.u32 %v168_v56, %v175_v33  ;;  %616 = vmatpush.bf16.msra.mxu2 %v761_v51 }
  0xc0   :  { %v178_v2 = vshrl.u32 %v160_v61, %v176_v62  ;;  %v181_v52 = vadd.s32 127, %v180_v63 }
  0xc2   :  { %v179_v3 = vor.u32 %v178_v2, %v177_v1  ;;  %v182_v4 = vshll.u32 %v181_v52, 23  ;;  %v782_v52 = vld [vmem:[%s992_s4] ss:$0 sm:$0xff] }
  0xc4   :  { %v183_v5 = vor.u32 4788187, %v182_v4  ;;  %v186_v8 = vcvt.s32.f32 %v179_v3 }
  0xc6   :  { %v184_v7 = vand.u32 2147483647, %v183_v5 }
  0xc8   :  { %v187_v9 = vmul.f32 %v186_v8, %v184_v7 }
  0xca   :  { %v188_v10 = vxor.u32 2147483648, %v187_v9 }
  0xcc   :  { %v189_v11 = vsel %vm68_vm12, %v188_v10, %v187_v9 }
  0xcd   :  { %v192_v13 = vsel %vm67_vm13, %v919_v15, %v189_v11  ;;  %v760_v15 = vld [vmem:[#allocation5] sm:$0xff] }
  0xce   :  { %v194_v14 = vmul.f32 %v192_v13, %v192_v13  ;;  %617 = vmatpush.bf16.msra.mxu2 %v760_v15 }
  0xd0   :  { %v195_v16 = vmul.f32 -0.001358992, %v194_v14  ;;  %v202_v17 = vmul.f32 -0.00019511016, %v194_v14 }
  0xd2   :  { %v196_v19 = vadd.f32 0.041655596, %v195_v16  ;;  %v203_v20 = vadd.f32 0.008332121, %v202_v17 }
  0xd4   :  { %v197_v23 = vmul.f32 %v196_v19, %v194_v14  ;;  %v204_v24 = vmul.f32 %v203_v20, %v194_v14 }
  0xd6   :  { %v198_v25 = vadd.f32 -0.4999988, %v197_v23  ;;  %v205_v26 = vadd.f32 -0.16666654, %v204_v24 }
  0xd8   :  { %v199_v28 = vmul.f32 %v198_v25, %v194_v14  ;;  %v206_v29 = vmul.f32 %v205_v26, %v194_v14 }
  0xda   :  { %v200_v30 = vadd.f32 1.0, %v199_v28  ;;  %v207_v22 = vadd.f32 1.0, %v206_v29 }
  0xdc   :  { %v208_v36 = vmul.f32 %v207_v22, %v192_v13  ;;  %v216_v37 = vxor.u32 2147483648, %v200_v30 }
  0xde   :  { %v213_v38 = vxor.u32 2147483648, %v208_v36  ;;  %v217_v40 = vsel %vm215_vm0, %v216_v37, %v208_v36  ;;  %v372_v42 = vsel %vm370_vm3, %v216_v37, %v208_v36 }
  0xe0   :  { %v214_v39 = vsel %vm212_vm15, %v200_v30, %v213_v38  ;;  %v369_v41 = vsel %vm367_vm2, %v200_v30, %v213_v38 }
  0xe1   :  { %v218_v43 = vsel %vm211_vm14, %v214_v39, %v217_v40  ;;  %v373_v44 = vsel %vm366_vm1, %v369_v41, %v372_v42 }
  0xe2   :  { %v219_v45 = vsel %vm209_vm4, nan, %v218_v43  ;;  %v374_v34 = vsel %vm209_vm4, nan, %v373_v44 }
  0xe3   :  { %v375_v35 = vpack.c.bf16 %v219_v45, %v219_v45  ;;  %v376_v46 = vpack.c.bf16 %v374_v34, %v374_v34 }
  0xe5   :  { %517 = vmatmul.bf16.vlgmr.msra.gmra.mxu0 %v375_v35  ;;  %530 = vmatmul.bf16.vlgmr.msra.gmra.mxu1 %v376_v46 }
 0x162   :  { %v518_v54 = vpop.f32.mrf.mxu0  ;;  %v531_v55 = vpop.f32.mrf.mxu1 }
 0x163   :  { %v519_v56 = vadd.f32 %v781_v53, %v518_v54 }
 0x165   :  { %v532_v57 = vadd.f32 %v531_v55, %v519_v56 }
 0x167   :  { %v535_v58 = vsub.f32 0.0, %v532_v57 }
 0x169   :  { %v536_v59 = vmul.f32 1.442695, %v535_v58 }
 0x16a   :  { %v520_v60 = vpop.f32.mrf.mxu0  ;;  %v533_v33 = vpop.f32.mrf.mxu1 }
 0x16b   :  { %785 = vpow2.f32 %v536_v59 }
 0x171   :  { %v786_v61 = vpop.eup %785 }
 0x172   :  { %v538_v62 = vadd.f32 1.0, %v786_v61 }
 0x174   :  { %787 = vrcp.f32 %v538_v62 }
 0x17a   :  { %v788_v63 = vpop.eup %787 }
 0x17b   :  { %v540_v1 = vmul.f32 %v788_v63, %v532_v57 }
 0x17d   :  { %v541_v2 = vpack.c.bf16 %v540_v1, %v540_v1 }
 0x17f   :  { %618 = vmatmul.bf16.vlgmr.msra.gmra.mxu2 %v541_v2 }
 0x202   :  { %v619_v3 = vpop.f32.mrf.mxu2 }
 0x203   :  { %v620_v4 = vadd.f32 %v782_v52, %v619_v3 }
 0x205   :  { %623 = vst [vmem:[#allocation7] sm:$0xff] %v620_v4 }
 0x206   :  { %634 = dma.vmem_to_hbm [thread:$0]  %s630_s8, 128, %s632_s11, [#allocation4]  }
 0x20a   :  { %v621_v5 = vpop.f32.mrf.mxu2 }
 0x20b   :  { %865 = dma.done.wait [#allocation4], 128  }
 0x20c   :  { %866 = vsyncadd [#allocation4], 4294967168 }
 0x20d   :  { %639 = vsyncpa [#allocation3], 1 }
 0x20e   :  { %640 = vsyncpa [#allocation6], 1 }
 0x20f   :  { %641 = vsyncpa [#allocation4], 1 }

</bundles_post_ra>
